<compile_context>
chip_gen: v7x
topology: tpu7x:2x2x1
jax: 0.10.0
libtpu: 0.0.40
codegen_flags: <defaults>
</compile_context>

<pallas_src>
import functools
import numpy as np
import jax
import jax.numpy as jnp
from jax.experimental import pallas as pl
from jax.experimental.pallas import tpu as pltpu


# ---------------------------------------------------------------------------
# Pallas kernels
# ---------------------------------------------------------------------------

def _vertex_transform_kernel(ct_ref, v_ref, cam_ref):
    # One grid step for ALL batches.  Layout: (batch, channel, vertex), vertices on lanes.
    # vertices_camera = up_to_homogeneous(verts) @ camera_transform   (camera_transform is (4,3))
    B = v_ref.shape[0]
    for b in range(B):                                   # static unroll, B is small
        ct = [ct_ref[b * 12 + k] for k in range(12)]     # camera_transform[b] (4,3) row-major, hoisted
        x = v_ref[b:b + 1, 0:1, :]                       # (1, 1, VP)
        y = v_ref[b:b + 1, 1:2, :]
        z = v_ref[b:b + 1, 2:3, :]
        for c in range(3):
            cam_ref[b:b + 1, c:c + 1, :] = x * ct[c] + y * ct[3 + c] + z * ct[6 + c] + ct[9 + c]
    # NOTE: vertices_clip (homog(cam) @ P^T) intentionally NOT computed — dead while the rasterizer is
    # stubbed.  If V ever reaches 10^5+, tile Vp on the grid and use (Vp/128, 128) channel slabs.


def vertex_transform_pallas(verts_t, cam_t_flat):
    B, _, Vp = verts_t.shape
    return pl.pallas_call(
        _vertex_transform_kernel,
        out_shape=jax.ShapeDtypeStruct((B, 3, Vp), jnp.float32),
        grid=(1,),                                        # single step: whole problem is ~B*4*VP floats
        in_specs=[
            pl.BlockSpec(memory_space=pltpu.MemorySpace.SMEM),   # camera_transform flat (B*12,)
            pl.BlockSpec((B, 3, Vp), lambda i: (0, 0, 0)),
        ],
        out_specs=pl.BlockSpec((B, 3, Vp), lambda i: (0, 0, 0)),
        compiler_params=pltpu.CompilerParams(dimension_semantics=("arbitrary",)),
    )(cam_t_flat, verts_t)


def _depth_to_pcd_kernel(mt_ref, brow_ref, rem_ref, depth_ref, out_ref, *,
                         tile_rows, width, voxel_size):
    # depth block: (1, tile_rows, 128) flat pixels ; out block: (1, 3, tile_rows, 128) channel slabs.
    # world_vox_c = round(d * (x*M[0,c] + y*M[1,c] + M[2,c]) + t_c) * voxel_size
    # where M = (inv_K^T @ diag(1,1,-1) @ to_world[:3,:]) / voxel_size and t = to_world[3,:] / voxel_size
    # were pre-fused in the wrapper (inv_K, z-flip, rigid transform and voxel quantization all folded).
    b = pl.program_id(0)
    r = pl.program_id(1)

    # Reconstruct (row, col) of each flattened pixel without per-element integer division:
    #   flat = base + s*128 + l,  base = base_row*width + rem  (per-row-tile scalars from SMEM)
    rem = rem_ref[r]
    base_row = brow_ref[r]
    s_i = jax.lax.broadcasted_iota(jnp.int32, (tile_rows, 128), 0)
    l_i = jax.lax.broadcasted_iota(jnp.int32, (tile_rows, 128), 1)
    v = (s_i * 128 + l_i + rem).astype(jnp.float32)          # < width + tile_rows*128 << 2^22 -> exact below
    rowoff = jnp.floor((v + np.float32(0.5)) * np.float32(1.0 / width))
    x = v - rowoff * np.float32(width)                        # pixel col (float, exact)
    y = rowoff + base_row.astype(jnp.float32)                 # pixel row (float, exact)

    d = depth_ref[0]                                           # (tile_rows, 128)

    m = [mt_ref[b * 12 + k] for k in range(12)]                # hoisted SMEM scalar reads (M row-major, then t)

    vox = np.float32(voxel_size)
    for c in range(3):
        out_ref[0, c, :, :] = jnp.round(d * (x * m[c] + y * m[3 + c] + m[6 + c]) + m[9 + c]) * vox


def _pick_tile_rows(rows_total, budget_bytes=8 << 20):
    # per-step VMEM ~ (depth 512 B + xyz 1536 B) per 128-lane pixel row = 2 KiB/row (x2 double-buffered
    # by Pallas -> 16 MiB at the default budget, safely under the 32 MiB vmem_limit set below).
    target = max(8, (budget_bytes // 2048) // 8 * 8)
    full = max(8, ((rows_total + 7) // 8) * 8)                 # don't tile past the (8-padded) problem
    tile = min(target, full)
    if rows_total >= 16:                                       # keep >=2 row-tiles when there is enough work
        half = max(8, (rows_total // 2) // 8 * 8)              # (v7x: 2 TensorCores need >=2 parallel steps
        tile = min(tile, half)                                 #  even at B == 1)
    return tile


def depth_to_pcd_pallas(depth_tiled, mt_flat, base_row, rem, *, tile_rows, width, voxel_size):
    B, rows_pad, _ = depth_tiled.shape
    kernel = functools.partial(_depth_to_pcd_kernel, tile_rows=tile_rows, width=width,
                               voxel_size=voxel_size)
    return pl.pallas_call(
        kernel,
        out_shape=jax.ShapeDtypeStruct((B, 3, rows_pad, 128), jnp.float32),
        grid=(B, rows_pad // tile_rows),
        in_specs=[
            pl.BlockSpec(memory_space=pltpu.MemorySpace.SMEM),            # fused M|t flat (B*12,)
            pl.BlockSpec(memory_space=pltpu.MemorySpace.SMEM),            # base_row per row-tile
            pl.BlockSpec(memory_space=pltpu.MemorySpace.SMEM),            # rem per row-tile
            pl.BlockSpec((1, tile_rows, 128), lambda b, r: (b, r, 0)),    # depth (B, rows_pad, 128)
        ],
        out_specs=pl.BlockSpec((1, 3, tile_rows, 128), lambda b, r: (b, 0, r, 0)),
        compiler_params=pltpu.CompilerParams(
            dimension_semantics=("parallel", "parallel"),
            vmem_limit_bytes=32 << 20),
    )(mt_flat, base_row, rem, depth_tiled)


# ---------------------------------------------------------------------------
# uniform_2_sphere (plain jnp; too small to benefit from a pallas_call)
# ---------------------------------------------------------------------------

def uniform_2_sphere(key, shape, z_min=-1.0, z_max=1.0, radius_min=1.0, radius_max=1.0):
    shape = tuple(shape)
    k1, k2, k3 = jax.random.split(key, 3)
    phi = jax.random.uniform(k1, shape, jnp.float32) * (2.0 * np.pi)
    cos_theta = jax.random.uniform(k2, shape, jnp.float32) * (z_max - z_min) + z_min
    radius = jax.random.uniform(k3, shape + (1,), jnp.float32) * (radius_max - radius_min) + radius_min
    sin_theta = jnp.sqrt(jnp.maximum(1.0 - cos_theta * cos_theta, 0.0))   # sin(acos(cos_theta))
    xyz = jnp.stack([sin_theta * jnp.cos(phi), sin_theta * jnp.sin(phi), cos_theta], axis=-1)
    return xyz * radius


# ---------------------------------------------------------------------------
# Renderer (JAX glue around the Pallas kernels)
# ---------------------------------------------------------------------------

class Renderer:
    def __init__(self, cfg):
        if cfg['render_downsample'] > 1:
            assert cfg['width'] % cfg['render_downsample'] == 0 and cfg['height'] % cfg['render_downsample'] == 0
            cfg['width'] = int(cfg['width'] / cfg['render_downsample'])
            cfg['height'] = int(cfg['height'] / cfg['render_downsample'])
            cfg['fx'] /= cfg['render_downsample']
            cfg['fy'] /= cfg['render_downsample']
            cfg['cx'] /= cfg['render_downsample']
            cfg['cy'] /= cfg['render_downsample']
        self.cfg = cfg
        W, H = cfg['width'], cfg['height']
        ds = cfg['render_downsample']
        fx, fy, cx, cy = cfg['fx'], cfg['fy'], cfg['cx'], cfg['cy']
        max_dist = cfg['max_dist'] * cfg['meter_to_unit']
        near, far = max_dist * 0.5, max_dist * 1.5

        # Stand-in for kaolin PinholeIntrinsics.projection_matrix() (OpenGL-style pinhole projection).
        # Kept for module-state parity; the clip-space path is currently dead (rasterizer stubbed).
        proj = np.array([
            [2.0 * fx / W, 0.0, 2.0 * (cx - W / 2.0) / W, 0.0],
            [0.0, 2.0 * fy / H, 2.0 * (cy - H / 2.0) / H, 0.0],
            [0.0, 0.0, -(far + near) / (far - near), -2.0 * far * near / (far - near)],
            [0.0, 0.0, -1.0, 0.0]], dtype=np.float32)
        self.projection_matrix = jnp.asarray(proj)

        # Full-resolution pixel intrinsics (net result of the K manipulation in the torch code for ds=1).
        K = np.array([[fx * ds, 0.0, cx * ds],
                      [0.0, fy * ds, cy * ds],
                      [0.0, 0.0, 1.0]], dtype=np.float32)
        self.inv_K = jnp.asarray(np.linalg.inv(K))
        # xy1 pixel grid is generated inside the Pallas kernel (no HBM constant).

    # --- forward ---------------------------------------------------------
    def forward(self, data, key, num_samples, postfix=''):
        cfg = self.cfg
        verts = data[f'obj_verts{postfix}']               # (B, V, 3) f32
        faces = data[f'obj_faces{postfix}']               # (B, F, 3) i32
        vert_labels = data[f'obj_vert_labels{postfix}']   # (B, V, 1) f32
        B, V, _ = verts.shape
        H, W = cfg['height'], cfg['width']

        # Camera transform: mean pose (180 deg about x * identity quat) + gaussian translation noise.
        R = np.diag([1.0, -1.0, -1.0]).astype(np.float32)
        t = np.asarray(cfg['cam_t_mean'], np.float32) * cfg['meter_to_unit']
        cam = np.eye(4, dtype=np.float32)
        cam[:3, :3] = R
        cam[:3, 3] = R @ (-t)
        cam4 = jnp.tile(jnp.asarray(cam)[None], (B, 1, 1))                # (B, 4, 4)
        t_noise = jax.random.normal(key, (B, 3), jnp.float32) * cfg['cam_t_std'] * cfg['meter_to_unit']
        cam4 = cam4.at[:, :3, 3].add(t_noise)
        # TODO(synk): scipy special_ortho_group random rotation jitter omitted (identity perturbation).
        camera_transform = jnp.transpose(cam4, (0, 2, 1))[:, :, :3]        # (B, 4, 3) row-vector convention

        # Append the ground plane to the mesh.
        verts_plane = jnp.asarray([[-1, -1, 0], [1, -1, 0], [1, 1, 0], [-1, 1, 0]], jnp.float32)
        faces_plane = jnp.asarray([[0, 1, 2], [0, 2, 3]], jnp.int32) + V
        verts_full = jnp.concatenate([verts, jnp.tile(verts_plane[None], (B, 1, 1))], axis=1)
        faces_full = jnp.concatenate([faces, jnp.tile(faces_plane[None], (B, 1, 1))], axis=1)
        vert_labels_full = jnp.concatenate([vert_labels, jnp.zeros_like(vert_labels[:, :4])], axis=1)

        depth, seg = self.render(verts_full, faces_full, vert_labels_full, camera_transform)

        # TODO(synk): perlin noise and kinect-azure noise (kornia remap / erosion / dilation) omitted;
        #             cfg['perlin_noise'] / cfg['image_noise'] are False.  render_downsample==1 -> no rescale.

        # Closed-form rigid inverse of the camera matrix (== inv(to_cam)[:, :, :3] of the torch code,
        # with to_cam = cam4^T): rows 0..2 = R, row 3 = (-R^T t)^T.
        Rb = cam4[:, :3, :3]
        tb = cam4[:, :3, 3]
        to_world = jnp.concatenate([Rb, -jnp.einsum('bij,bi->bj', Rb, tb)[:, None, :]], axis=1)  # (B, 4, 3)

        # xyz already voxel-quantized (the round is fused into the kernel); channel-major (B, 3, Np).
        xyz_vox_cm = self.depth_to_pcd(depth, to_world)
        Np = xyz_vox_cm.shape[-1]
        seg_flat = seg.reshape(B, H * W)
        if Np > H * W:                                              # pad seg to match pixel padding
            seg_flat = jnp.pad(seg_flat, ((0, 0), (0, Np - H * W)))
        observation, _ = self.pcd_to_observation(xyz_vox_cm, seg_flat, num_samples)
        return observation

    # --- render ----------------------------------------------------------
    def render(self, verts, faces, vert_labels, camera_transform):
        B, Vt, _ = verts.shape
        H, W = self.cfg['height'], self.cfg['width']
        Vp = max(128, ((Vt + 127) // 128) * 128)          # pad vertices to the lane width

        verts_t = jnp.zeros((B, 3, Vp), jnp.float32).at[:, :, :Vt].set(jnp.transpose(verts, (0, 2, 1)))
        cam_flat = camera_transform.reshape(B * 12).astype(jnp.float32)

        vertices_camera = vertex_transform_pallas(verts_t, cam_flat)      # (B, 3, Vp)
        # vertices_clip deliberately not computed: dead while the rasterizer below is stubbed.

        # TODO(synk): nvdiffrast rasterize/interpolate has no Pallas/TPU equivalent; substitute a
        # deterministic synthetic raster (constant camera-space depth, centered object seg mask).
        mean_neg_z = -jnp.mean(vertices_camera[:, 2, :Vt], axis=-1)       # depth = -out[..., 0]
        depth = jnp.broadcast_to(mean_neg_z[:, None, None], (B, H, W)).astype(jnp.float32)
        yy, xx = np.meshgrid(np.arange(H), np.arange(W), indexing='ij')
        obj_mask = ((xx >= W // 4) & (xx < 3 * W // 4) & (yy >= H // 4) & (yy < 3 * H // 4))
        seg_val = jnp.round(jnp.max(vert_labels[..., 0], axis=1)).astype(jnp.int32)
        seg = jnp.asarray(obj_mask, jnp.int32)[None, :, :] * seg_val[:, None, None]
        return depth, seg

    # --- depth_to_pcd (+ fused voxel quantization) ------------------------
    def depth_to_pcd(self, depth, to_world):
        B, H, W = depth.shape
        voxel = float(self.cfg['voxel_size'])

        # Fuse inv_K, the camera z-flip, the rigid to_world transform and the 1/voxel_size scale into
        # one per-batch 3x3 matrix M (+ translation t):  M = (inv_K^T diag(1,1,-1) to_world[:3]) / vox.
        A = self.inv_K * jnp.array([1.0, 1.0, -1.0], jnp.float32)[:, None]
        M = jnp.einsum('ij,bic->bjc', A, to_world[:, :3, :]) * (1.0 / voxel)     # (B, 3, 3)
        tq = to_world[:, 3, :] * (1.0 / voxel)                                    # (B, 3)
        mt_flat = jnp.concatenate([M.reshape(B, 9), tq], axis=1).reshape(B * 12).astype(jnp.float32)

        # Flatten pixels for lane-dense (x128) stores regardless of W; pad to a whole number of tiles.
        P = H * W
        rows_total = -(-P // 128)
        tile_rows = _pick_tile_rows(rows_total)
        rows_pad = -(-rows_total // tile_rows) * tile_rows
        P_pad = rows_pad * 128

        d_flat = depth.reshape(B, P).astype(jnp.float32)
        if P_pad > P:
            d_flat = jnp.pad(d_flat, ((0, 0), (0, P_pad - P)))
        d_tiled = d_flat.reshape(B, rows_pad, 128)

        # Per-row-tile flat-index decomposition (so the kernel never does a per-element division by W).
        num_rt = rows_pad // tile_rows
        base = np.arange(num_rt, dtype=np.int64) * (tile_rows * 128)
        base_row = (base // W).astype(np.int32)
        rem = (base - base_row.astype(np.int64) * W).astype(np.int32)

        out = depth_to_pcd_pallas(d_tiled, mt_flat, jnp.asarray(base_row), jnp.asarray(rem),
                                  tile_rows=tile_rows, width=W, voxel_size=voxel)   # (B, 3, rows_pad, 128)
        # Stay channel-major: reshape only (no transpose / extra HBM pass).
        return out.reshape(B, 3, P_pad)

    # --- pcd_to_observation ----------------------------------------------
    @staticmethod
    def pcd_to_observation(xyz_vox_cm, seg_flat, num_samples):
        # xyz_vox_cm: (B, 3, Np) channel-major, already voxel-quantized (fused into depth_to_pcd kernel).
        # TODO(synk): torch.unique voxel dedup + scatter_reduce(amax) labels + randperm resampling are
        #             data-dependent-shape ops; simplified to the first num_samples valid points,
        #             selected with an O(N) cumsum + scatter compaction (no full sort).
        B, _, Np = xyz_vox_cm.shape
        mask = seg_flat > 0                                         # (B, Np)
        pos = jnp.cumsum(mask, axis=1) - 1                          # rank among valid points
        slot = jnp.where(mask & (pos < num_samples), pos, num_samples)   # overflow/invalid -> spare slot
        src = jnp.broadcast_to(jnp.arange(Np, dtype=jnp.int32)[None, :], (B, Np))
        idx = jnp.zeros((B, num_samples + 1), jnp.int32).at[
            jnp.arange(B)[:, None], slot].set(src)[:, :num_samples]      # (B, S) first-S valid indices
        idx3 = jnp.broadcast_to(idx[:, None, :], (B, 3, num_samples))
        pts = jnp.transpose(jnp.take_along_axis(xyz_vox_cm, idx3, axis=2), (0, 2, 1))   # tiny (B, S, 3)
        labels = jnp.take_along_axis(seg_flat.astype(jnp.float32), idx, axis=1)

        count = jnp.sum(mask, axis=1)                               # (B,)
        valid = (jnp.arange(num_samples)[None, :] < count[:, None]).astype(jnp.float32)
        obs = jnp.concatenate([pts, labels[..., None]], axis=-1) * valid[..., None]
        empty = count == 0
        empty_obs = jnp.concatenate([jnp.zeros((B, num_samples, 3), jnp.float32),
                                     jnp.ones((B, num_samples, 1), jnp.float32)], axis=-1)
        obs = jnp.where(empty[:, None, None], empty_obs, obs)
        return obs, empty


# ---------------------------------------------------------------------------
# main
# ---------------------------------------------------------------------------

if __name__ == "__main__":
    cfg = {
        'width': 16, 'height': 16, 'fx': 20.0, 'fy': 20.0, 'cx': 8.0, 'cy': 8.0,
        'render_downsample': 1,
        'max_dist': 2.0, 'meter_to_unit': 1.0, 'unit_to_meter': 1.0,
        'cam_t_mean': [0.0, 0.0, -1.5], 'cam_t_std': 0.01,
        'cam_q_mean': [0.0, 0.0, 0.0, 1.0], 'cam_r_std': 0.0,
        'perlin_noise': False, 'image_noise': False,
        'perlin_noise_res': 4, 'perlin_noise_scale': 0.0,
        'voxel_size': 0.05,
        'z_range': [-0.5, 0.5], 'distance_range': [1.0, 1.5],
    }

    key = jax.random.PRNGKey(0)
    k_v, k_f, k_cam, k_sph = jax.random.split(key, 4)

    B, V, F = 2, 8, 4
    num_samples = 8
    verts = jax.random.normal(k_v, (B, V, 3), jnp.float32) * 0.3
    faces = jax.random.randint(k_f, (B, F, 3), 0, V, dtype=jnp.int32)
    vert_labels = jnp.ones((B, V, 1), jnp.float32) * jnp.arange(1, B + 1, dtype=jnp.float32)[:, None, None]
    data = {'obj_verts': verts, 'obj_faces': faces, 'obj_vert_labels': vert_labels}

    renderer = Renderer(cfg)
    observation = renderer.forward(data, key=k_cam, num_samples=num_samples)
    observation = jax.block_until_ready(observation)
    assert observation.shape == (B, num_samples, 4)

    # also exercise the uniform_2_sphere dependent function (used by get_random_extrinsics)
    origins = uniform_2_sphere(k_sph, (4, 1),
                               z_min=cfg['z_range'][0], z_max=cfg['z_range'][1],
                               radius_min=cfg['distance_range'][0],
                               radius_max=cfg['distance_range'][1]).reshape(-1, 3)
    origins = jax.block_until_ready(origins)
    assert origins.shape == (4, 3)

    print("KERNEL_OK")
</pallas_src>

<mosaic_0001>
module attributes {stable_mosaic.version = 11 : i64} {
  func.func @_vertex_transform_kernel(%arg0: i32, %arg1: memref<24xf32, #tpu.memory_space<smem>>, %arg2: memref<2x3x128xf32, #tpu.memory_space<vmem>>, %arg3: memref<2x3x128xf32, #tpu.memory_space<vmem>>) attributes {dimension_semantics = [#tpu.dimension_semantics<arbitrary>], iteration_bounds = array<i64: 1>, scalar_prefetch = 0 : i64, scratch_operands = 0 : i64, tpu.core_type = #tpu.core_type<tc>, window_params = [{transform_indices = @transform_0, window_bounds = array<i64: 24>}, {pipeline_mode = #tpu.pipeline_mode<synchronous>, transform_indices = @transform_1, window_bounds = array<i64: 2, 3, 128>}, {pipeline_mode = #tpu.pipeline_mode<synchronous>, transform_indices = @transform_2, window_bounds = array<i64: 2, 3, 128>}]} {
    %c0 = arith.constant 0 : index
    %0 = memref.load %arg1[%c0] : memref<24xf32, #tpu.memory_space<smem>>
    %c1 = arith.constant 1 : index
    %1 = memref.load %arg1[%c1] : memref<24xf32, #tpu.memory_space<smem>>
    %c2 = arith.constant 2 : index
    %2 = memref.load %arg1[%c2] : memref<24xf32, #tpu.memory_space<smem>>
    %c3 = arith.constant 3 : index
    %3 = memref.load %arg1[%c3] : memref<24xf32, #tpu.memory_space<smem>>
    %c4 = arith.constant 4 : index
    %4 = memref.load %arg1[%c4] : memref<24xf32, #tpu.memory_space<smem>>
    %c5 = arith.constant 5 : index
    %5 = memref.load %arg1[%c5] : memref<24xf32, #tpu.memory_space<smem>>
    %c6 = arith.constant 6 : index
    %6 = memref.load %arg1[%c6] : memref<24xf32, #tpu.memory_space<smem>>
    %c7 = arith.constant 7 : index
    %7 = memref.load %arg1[%c7] : memref<24xf32, #tpu.memory_space<smem>>
    %c8 = arith.constant 8 : index
    %8 = memref.load %arg1[%c8] : memref<24xf32, #tpu.memory_space<smem>>
    %c9 = arith.constant 9 : index
    %9 = memref.load %arg1[%c9] : memref<24xf32, #tpu.memory_space<smem>>
    %c10 = arith.constant 10 : index
    %10 = memref.load %arg1[%c10] : memref<24xf32, #tpu.memory_space<smem>>
    %c11 = arith.constant 11 : index
    %11 = memref.load %arg1[%c11] : memref<24xf32, #tpu.memory_space<smem>>
    %c0_0 = arith.constant 0 : index
    %c0_1 = arith.constant 0 : index
    %c0_2 = arith.constant 0 : index
    %12 = vector.load %arg2[%c0_0, %c0_1, %c0_2] : memref<2x3x128xf32, #tpu.memory_space<vmem>>, vector<1x1x128xf32>
    %c0_3 = arith.constant 0 : index
    %c1_4 = arith.constant 1 : index
    %c0_5 = arith.constant 0 : index
    %13 = vector.load %arg2[%c0_3, %c1_4, %c0_5] : memref<2x3x128xf32, #tpu.memory_space<vmem>>, vector<1x1x128xf32>
    %c0_6 = arith.constant 0 : index
    %c2_7 = arith.constant 2 : index
    %c0_8 = arith.constant 0 : index
    %14 = vector.load %arg2[%c0_6, %c2_7, %c0_8] : memref<2x3x128xf32, #tpu.memory_space<vmem>>, vector<1x1x128xf32>
    %15 = vector.broadcast %0 : f32 to vector<1x1x128xf32>
    %16 = arith.mulf %12, %15 : vector<1x1x128xf32>
    %17 = vector.broadcast %3 : f32 to vector<1x1x128xf32>
    %18 = arith.mulf %13, %17 : vector<1x1x128xf32>
    %19 = arith.addf %16, %18 : vector<1x1x128xf32>
    %20 = vector.broadcast %6 : f32 to vector<1x1x128xf32>
    %21 = arith.mulf %14, %20 : vector<1x1x128xf32>
    %22 = arith.addf %19, %21 : vector<1x1x128xf32>
    %23 = vector.broadcast %9 : f32 to vector<1x1x128xf32>
    %24 = arith.addf %22, %23 : vector<1x1x128xf32>
    %c0_9 = arith.constant 0 : index
    %c0_10 = arith.constant 0 : index
    %c0_11 = arith.constant 0 : index
    %25 = vector.load %arg3[%c0_9, %c0_10, %c0_11] : memref<2x3x128xf32, #tpu.memory_space<vmem>>, vector<1x1x128xf32>
    tpu.vector_store %arg3[%c0_9, %c0_10, %c0_11], %24 {strides = array<i32>} : memref<2x3x128xf32, #tpu.memory_space<vmem>>, vector<1x1x128xf32>,
    %26 = vector.broadcast %1 : f32 to vector<1x1x128xf32>
    %27 = arith.mulf %12, %26 : vector<1x1x128xf32>
    %28 = vector.broadcast %4 : f32 to vector<1x1x128xf32>
    %29 = arith.mulf %13, %28 : vector<1x1x128xf32>
    %30 = arith.addf %27, %29 : vector<1x1x128xf32>
    %31 = vector.broadcast %7 : f32 to vector<1x1x128xf32>
    %32 = arith.mulf %14, %31 : vector<1x1x128xf32>
    %33 = arith.addf %30, %32 : vector<1x1x128xf32>
    %34 = vector.broadcast %10 : f32 to vector<1x1x128xf32>
    %35 = arith.addf %33, %34 : vector<1x1x128xf32>
    %c0_12 = arith.constant 0 : index
    %c1_13 = arith.constant 1 : index
    %c0_14 = arith.constant 0 : index
    %36 = vector.load %arg3[%c0_12, %c1_13, %c0_14] : memref<2x3x128xf32, #tpu.memory_space<vmem>>, vector<1x1x128xf32>
    tpu.vector_store %arg3[%c0_12, %c1_13, %c0_14], %35 {strides = array<i32>} : memref<2x3x128xf32, #tpu.memory_space<vmem>>, vector<1x1x128xf32>,
    %37 = vector.broadcast %2 : f32 to vector<1x1x128xf32>
    %38 = arith.mulf %12, %37 : vector<1x1x128xf32>
    %39 = vector.broadcast %5 : f32 to vector<1x1x128xf32>
    %40 = arith.mulf %13, %39 : vector<1x1x128xf32>
    %41 = arith.addf %38, %40 : vector<1x1x128xf32>
    %42 = vector.broadcast %8 : f32 to vector<1x1x128xf32>
    %43 = arith.mulf %14, %42 : vector<1x1x128xf32>
    %44 = arith.addf %41, %43 : vector<1x1x128xf32>
    %45 = vector.broadcast %11 : f32 to vector<1x1x128xf32>
    %46 = arith.addf %44, %45 : vector<1x1x128xf32>
    %c0_15 = arith.constant 0 : index
    %c2_16 = arith.constant 2 : index
    %c0_17 = arith.constant 0 : index
    %47 = vector.load %arg3[%c0_15, %c2_16, %c0_17] : memref<2x3x128xf32, #tpu.memory_space<vmem>>, vector<1x1x128xf32>
    tpu.vector_store %arg3[%c0_15, %c2_16, %c0_17], %46 {strides = array<i32>} : memref<2x3x128xf32, #tpu.memory_space<vmem>>, vector<1x1x128xf32>,
    %c12 = arith.constant 12 : index
    %48 = memref.load %arg1[%c12] : memref<24xf32, #tpu.memory_space<smem>>
    %c13 = arith.constant 13 : index
    %49 = memref.load %arg1[%c13] : memref<24xf32, #tpu.memory_space<smem>>
    %c14 = arith.constant 14 : index
    %50 = memref.load %arg1[%c14] : memref<24xf32, #tpu.memory_space<smem>>
    %c15 = arith.constant 15 : index
    %51 = memref.load %arg1[%c15] : memref<24xf32, #tpu.memory_space<smem>>
    %c16 = arith.constant 16 : index
    %52 = memref.load %arg1[%c16] : memref<24xf32, #tpu.memory_space<smem>>
    %c17 = arith.constant 17 : index
    %53 = memref.load %arg1[%c17] : memref<24xf32, #tpu.memory_space<smem>>
    %c18 = arith.constant 18 : index
    %54 = memref.load %arg1[%c18] : memref<24xf32, #tpu.memory_space<smem>>
    %c19 = arith.constant 19 : index
    %55 = memref.load %arg1[%c19] : memref<24xf32, #tpu.memory_space<smem>>
    %c20 = arith.constant 20 : index
    %56 = memref.load %arg1[%c20] : memref<24xf32, #tpu.memory_space<smem>>
    %c21 = arith.constant 21 : index
    %57 = memref.load %arg1[%c21] : memref<24xf32, #tpu.memory_space<smem>>
    %c22 = arith.constant 22 : index
    %58 = memref.load %arg1[%c22] : memref<24xf32, #tpu.memory_space<smem>>
    %c23 = arith.constant 23 : index
    %59 = memref.load %arg1[%c23] : memref<24xf32, #tpu.memory_space<smem>>
    %c1_18 = arith.constant 1 : index
    %c0_19 = arith.constant 0 : index
    %c0_20 = arith.constant 0 : index
    %60 = vector.load %arg2[%c1_18, %c0_19, %c0_20] : memref<2x3x128xf32, #tpu.memory_space<vmem>>, vector<1x1x128xf32>
    %c1_21 = arith.constant 1 : index
    %c1_22 = arith.constant 1 : index
    %c0_23 = arith.constant 0 : index
    %61 = vector.load %arg2[%c1_21, %c1_22, %c0_23] : memref<2x3x128xf32, #tpu.memory_space<vmem>>, vector<1x1x128xf32>
    %c1_24 = arith.constant 1 : index
    %c2_25 = arith.constant 2 : index
    %c0_26 = arith.constant 0 : index
    %62 = vector.load %arg2[%c1_24, %c2_25, %c0_26] : memref<2x3x128xf32, #tpu.memory_space<vmem>>, vector<1x1x128xf32>
    %63 = vector.broadcast %48 : f32 to vector<1x1x128xf32>
    %64 = arith.mulf %60, %63 : vector<1x1x128xf32>
    %65 = vector.broadcast %51 : f32 to vector<1x1x128xf32>
    %66 = arith.mulf %61, %65 : vector<1x1x128xf32>
    %67 = arith.addf %64, %66 : vector<1x1x128xf32>
    %68 = vector.broadcast %54 : f32 to vector<1x1x128xf32>
    %69 = arith.mulf %62, %68 : vector<1x1x128xf32>
    %70 = arith.addf %67, %69 : vector<1x1x128xf32>
    %71 = vector.broadcast %57 : f32 to vector<1x1x128xf32>
    %72 = arith.addf %70, %71 : vector<1x1x128xf32>
    %c1_27 = arith.constant 1 : index
    %c0_28 = arith.constant 0 : index
    %c0_29 = arith.constant 0 : index
    %73 = vector.load %arg3[%c1_27, %c0_28, %c0_29] : memref<2x3x128xf32, #tpu.memory_space<vmem>>, vector<1x1x128xf32>
    tpu.vector_store %arg3[%c1_27, %c0_28, %c0_29], %72 {strides = array<i32>} : memref<2x3x128xf32, #tpu.memory_space<vmem>>, vector<1x1x128xf32>,
    %74 = vector.broadcast %49 : f32 to vector<1x1x128xf32>
    %75 = arith.mulf %60, %74 : vector<1x1x128xf32>
    %76 = vector.broadcast %52 : f32 to vector<1x1x128xf32>
    %77 = arith.mulf %61, %76 : vector<1x1x128xf32>
    %78 = arith.addf %75, %77 : vector<1x1x128xf32>
    %79 = vector.broadcast %55 : f32 to vector<1x1x128xf32>
    %80 = arith.mulf %62, %79 : vector<1x1x128xf32>
    %81 = arith.addf %78, %80 : vector<1x1x128xf32>
    %82 = vector.broadcast %58 : f32 to vector<1x1x128xf32>
    %83 = arith.addf %81, %82 : vector<1x1x128xf32>
    %c1_30 = arith.constant 1 : index
    %c1_31 = arith.constant 1 : index
    %c0_32 = arith.constant 0 : index
    %84 = vector.load %arg3[%c1_30, %c1_31, %c0_32] : memref<2x3x128xf32, #tpu.memory_space<vmem>>, vector<1x1x128xf32>
    tpu.vector_store %arg3[%c1_30, %c1_31, %c0_32], %83 {strides = array<i32>} : memref<2x3x128xf32, #tpu.memory_space<vmem>>, vector<1x1x128xf32>,
    %85 = vector.broadcast %50 : f32 to vector<1x1x128xf32>
    %86 = arith.mulf %60, %85 : vector<1x1x128xf32>
    %87 = vector.broadcast %53 : f32 to vector<1x1x128xf32>
    %88 = arith.mulf %61, %87 : vector<1x1x128xf32>
    %89 = arith.addf %86, %88 : vector<1x1x128xf32>
    %90 = vector.broadcast %56 : f32 to vector<1x1x128xf32>
    %91 = arith.mulf %62, %90 : vector<1x1x128xf32>
    %92 = arith.addf %89, %91 : vector<1x1x128xf32>
    %93 = vector.broadcast %59 : f32 to vector<1x1x128xf32>
    %94 = arith.addf %92, %93 : vector<1x1x128xf32>
    %c1_33 = arith.constant 1 : index
    %c2_34 = arith.constant 2 : index
    %c0_35 = arith.constant 0 : index
    %95 = vector.load %arg3[%c1_33, %c2_34, %c0_35] : memref<2x3x128xf32, #tpu.memory_space<vmem>>, vector<1x1x128xf32>
    tpu.vector_store %arg3[%c1_33, %c2_34, %c0_35], %94 {strides = array<i32>} : memref<2x3x128xf32, #tpu.memory_space<vmem>>, vector<1x1x128xf32>,
    return
  }
  func.func @transform_0(%arg0: i32) -> i32 {
    %c0_i32 = arith.constant 0 : i32
    %c0_i32_0 = arith.constant 0 : i32
    return %c0_i32 : i32
  }
  func.func @transform_1(%arg0: i32) -> (i32, i32, i32) {
    %c0_i32 = arith.constant 0 : i32
    %c0_i32_0 = arith.constant 0 : i32
    %c0_i32_1 = arith.constant 0 : i32
    %c0_i32_2 = arith.constant 0 : i32
    return %c0_i32, %c0_i32_0, %c0_i32_1 : i32, i32, i32
  }
  func.func @transform_2(%arg0: i32) -> (i32, i32, i32) {
    %c0_i32 = arith.constant 0 : i32
    %c0_i32_0 = arith.constant 0 : i32
    %c0_i32_1 = arith.constant 0 : i32
    %c0_i32_2 = arith.constant 0 : i32
    return %c0_i32, %c0_i32_0, %c0_i32_1 : i32, i32, i32
  }
}

</mosaic_0001>

<bundles_post_ra>
// kernel: tpu_custom_call.1
= control target key start
LH: loop header
LB: loop body
LE: loop exit
PB: predicated region body
PF: predicated region fallthrough
CT: control target
= control target key end

     0   :  { %7 = vsyncpa [#allocation3], 0  ;;  %s280_s0 = inlined_call_operand.vmem [shape: f32[24], index: 0, kind: input, shape index: {}]   ;;  %s281_s1 = inlined_call_operand.vmem [shape: f32[2,3,128], index: 1, kind: input, shape index: {}]   ;;  %s282_s2 = inlined_call_operand.vmem [shape: f32[2,3,128], index: 2, kind: output, shape index: {}]  }
   0x1   :  { %s14_s11 = sshll.u32 %s280_s0, 4  ;;  %s15_s11 = int_to_ptr.vmem [resolvable:$true] %s14_s11 }
   0x2   :  { %s157_s12 = scalar_lea.vmem %s15_s11, 16  ;;  %p162_p1 = scmp.lt.s32.totalorder %s15_s11, %s15_s11 }
   0x3   :  { %p158_p0 = scmp.ne.s32.totalorder %s15_s11, %s157_s12  ;;  %p163_p2 = scmp.lt.s32.totalorder %s157_s12, %s157_s12 }
   0x5   :  { %p164_p3 = por %p163_p2, %p162_p1 }
   0x7   :  { %p165_p4 = pnand %p164_p3, %p158_p0 }
   0x9   :  { %168 = shalt.err (!%p165_p4)
}
   0xa   :  { %s171_s13 = smov [#allocation2]  }
   0xb   :  { %17 = dma.vmem_to_smem %s15_s11, 16, %s171_s13, [#allocation3]  }
   0xc   :  { %169 = dma.done.wait [#allocation3], 16  }
   0xd   :  { %170 = vsyncadd [#allocation3], 4294967280 }
   0xe   :  { %23 = sfence }
   0xf   :  { %s24_s14 = sld [smem:[#allocation2]]  ;;  %s129_s15 = sld [smem:[#allocation2 + $0x3]]  ;;  %v36_v0 = vld [vmem:[%s281_s1] sm:$0x1]  ;;  %v37_v1 = vld [vmem:[%s281_s1 + $0x1] sm:$0x1] }
  0x10   :  { %s132_s16 = sld [smem:[#allocation2 + $0x6]]  ;;  %s190_s17 = sld [smem:[#allocation2 + $0x9]]  ;;  %v38_v2 = vld [vmem:[%s281_s1 + $0x2] sm:$0x1]  ;;  %v150_v19 = vld [vmem:[%s281_s1 + $0x4] sm:$0x1] }
  0x11   :  { %s127_s18 = sld [smem:[#allocation2 + $0x1]]  ;;  %s130_s0 = sld [smem:[#allocation2 + $0x4]]  ;;  %v151_v24 = vld [vmem:[%s281_s1 + $0x5] sm:$0x1]  ;;  %v152_v25 = vld [vmem:[%s281_s1 + $0x6] sm:$0x1] }
  0x12   :  { %s133_s21 = sld [smem:[#allocation2 + $0x7]]  ;;  %s195_s22 = sld [smem:[#allocation2 + $0xa]] }
  0x13   :  { %s200_s25 = sld [smem:[#allocation2 + $0x2]]  ;;  %s202_s26 = sld [smem:[#allocation2 + $0x5]] }
  0x14   :  { %s207_s29 = sld [smem:[#allocation2 + $0x8]]  ;;  %s209_s30 = sld [smem:[#allocation2 + $0xb]] }
  0x15   :  { %v39_v3 = vstv %s24_s14  ;;  %v41_v4 = vstv %s129_s15  ;;  %s211_s3 = sld [smem:[#allocation2 + $0xc]]  ;;  %s213_s4 = sld [smem:[#allocation2 + $0xf]] }
  0x16   :  { %v40_v5 = vmul.f32 %v39_v3, %v36_v0  ;;  %v42_v6 = vmul.f32 %v41_v4, %v37_v1  ;;  %v44_v7 = vstv %s132_s16  ;;  %s215_s5 = sld [smem:[#allocation2 + $0x12]]  ;;  %s217_s6 = sld [smem:[#allocation2 + $0xd]]  ;;  %v47_v15 = vstv %s190_s17 }
  0x17   :  { %v45_v8 = vmul.f32 %v44_v7, %v38_v2  ;;  %v50_v9 = vstv %s127_s18  ;;  %v52_v10 = vstv %s130_s0  ;;  %s219_s7 = sld [smem:[#allocation2 + $0x10]]  ;;  %s221_s8 = sld [smem:[#allocation2 + $0x15]] }
  0x18   :  { %v43_v11 = vadd.f32 %v42_v6, %v40_v5  ;;  %v51_v12 = vmul.f32 %v50_v9, %v36_v0  ;;  %v53_v13 = vmul.f32 %v52_v10, %v37_v1  ;;  %v55_v14 = vstv %s133_s21  ;;  %s223_s9 = sld [smem:[#allocation2 + $0x13]]  ;;  %s231_s12 = sld [smem:[#allocation2 + $0xe]] }
  0x19   :  { %v56_v16 = vmul.f32 %v55_v14, %v38_v2  ;;  %v61_v17 = vstv %s200_s25  ;;  %v63_v18 = vstv %s202_s26  ;;  %s233_s13 = sld [smem:[#allocation2 + $0x11]]  ;;  %s241_s18 = sld [smem:[#allocation2 + $0x14]]  ;;  %v58_v26 = vstv %s195_s22 }
  0x1a   :  { %v46_v20 = vadd.f32 %v45_v8, %v43_v11  ;;  %v54_v21 = vadd.f32 %v53_v13, %v51_v12  ;;  %v62_v22 = vmul.f32 %v61_v17, %v36_v0  ;;  %v64_v23 = vmul.f32 %v63_v18, %v37_v1  ;;  %s247_s0 = sld [smem:[#allocation2 + $0x16]]  ;;  %s251_s1 = sld [smem:[#allocation2 + $0x17]] }
  0x1b   :  { %v66_v27 = vstv %s207_s29  ;;  %v88_v28 = vstv %s211_s3  ;;  %v90_v29 = vstv %s213_s4  ;;  %v69_v34 = vstv %s209_s30 }
  0x1c   :  { %v48_v30 = vadd.f32 %v47_v15, %v46_v20  ;;  %v57_v31 = vadd.f32 %v56_v16, %v54_v21  ;;  %v65_v32 = vadd.f32 %v64_v23, %v62_v22  ;;  %v67_v33 = vmul.f32 %v66_v27, %v38_v2 }
  0x1d   :  { %v89_v35 = vmul.f32 %v150_v19, %v88_v28  ;;  %v91_v36 = vmul.f32 %v151_v24, %v90_v29  ;;  %v93_v37 = vstv %s215_s5  ;;  %v100_v41 = vstv %s217_s6 }
  0x1e   :  { %49 = vst [vmem:[%s282_s2] sm:$0x1] %v48_v30  ;;  %v59_v38 = vadd.f32 %v58_v26, %v57_v31  ;;  %v68_v39 = vadd.f32 %v67_v33, %v65_v32  ;;  %v94_v40 = vmul.f32 %v152_v25, %v93_v37  ;;  %v101_v43 = vmul.f32 %v150_v19, %v100_v41 }
  0x1f   :  { %v92_v42 = vadd.f32 %v91_v36, %v89_v35  ;;  %v102_v44 = vstv %s219_s7  ;;  %v105_v45 = vstv %s223_s9  ;;  %v96_v47 = vstv %s221_s8 }
  0x20   :  { %60 = vst [vmem:[%s282_s2 + $0x1] sm:$0x1] %v59_v38  ;;  %v70_v46 = vadd.f32 %v69_v34, %v68_v39  ;;  %v103_v48 = vmul.f32 %v151_v24, %v102_v44  ;;  %v106_v49 = vmul.f32 %v152_v25, %v105_v45  ;;  %v111_v51 = vstv %s231_s12 }
  0x21   :  { %v95_v50 = vadd.f32 %v94_v40, %v92_v42  ;;  %v113_v52 = vstv %s233_s13  ;;  %v116_v53 = vstv %s241_s18  ;;  %v112_v55 = vmul.f32 %v150_v19, %v111_v51 }
  0x22   :  { %71 = vst [vmem:[%s282_s2 + $0x2] sm:$0x1] %v70_v46  ;;  %v104_v54 = vadd.f32 %v103_v48, %v101_v43  ;;  %v114_v56 = vmul.f32 %v151_v24, %v113_v52  ;;  %v117_v57 = vmul.f32 %v152_v25, %v116_v53  ;;  %v108_v59 = vstv %s247_s0 }
  0x23   :  { %v97_v58 = vadd.f32 %v96_v47, %v95_v50  ;;  %v119_v62 = vstv %s251_s1 }
  0x24   :  { %v107_v60 = vadd.f32 %v106_v49, %v104_v54  ;;  %v115_v61 = vadd.f32 %v114_v56, %v112_v55 }
  0x25   :  { %153 = vst [vmem:[%s282_s2 + $0x4] sm:$0x1] %v97_v58 }
  0x26   :  { %v109_v63 = vadd.f32 %v108_v59, %v107_v60  ;;  %v118_v0 = vadd.f32 %v117_v57, %v115_v61 }
  0x28   :  { %154 = vst [vmem:[%s282_s2 + $0x5] sm:$0x1] %v109_v63  ;;  %v120_v1 = vadd.f32 %v119_v62, %v118_v0 }
  0x2a   :  { %155 = vst [vmem:[%s282_s2 + $0x6] sm:$0x1] %v120_v1 }
  0x2b   :  { %126 = vsyncpa [#allocation3], 1 }

</bundles_post_ra>
